<compile_context>
chip_gen: v5e
topology: v5e:2x2
jax: 0.10.0
libtpu: 0.0.40
codegen_flags: <defaults>
</compile_context>

<pallas_src>
import functools

import jax
import jax.numpy as jnp
from jax.experimental import pallas as pl
from jax.experimental.pallas import tpu as pltpu

LEAKY_SLOPE = 0.01   # PyTorch nn.LeakyReLU default negative_slope
BN_EPS = 1e-5        # PyTorch nn.BatchNorm2d default eps


def _round_up(x, m):
    return (x + m - 1) // m * m


# ----------------------------------------------------------------------------
# Fused kernel: conv1 + LeakyReLU + BN1 + conv2 + LeakyReLU + BN2.
#   x_ref   : (Cp, L) f32, row = channel, lane = img*H*W + r*W + c, L = N*H*W
#   w1_ref  : (Cp, 9*Cp) f32, column = (ky*3+kx)*Cp + ci   (zero-padded)
#   w2_ref  : (Cp, 9*Cp) f32
#   bnp_ref : (6, Cp, 1) f32 = [b1, g1, beta1, b2, g2, beta2]
#   o_ref   : (Cp, L) f32
#   im_ref  : VMEM scratch (9*Cp, L) f32 — shared im2col buffer for both convs
# ----------------------------------------------------------------------------
def _convblock_kernel(x_ref, w1_ref, w2_ref, bnp_ref, o_ref, im_ref,
                      *, n, cp, h, w):
    hw = h * w
    L = n * hw
    inv_cnt = jnp.float32(1.0 / L)

    # --- per-lane (row, col) image coordinates, computed ONCE ---------------
    # f32 floor-division is exact for L < 2^24.
    lane = jax.lax.broadcasted_iota(jnp.int32, (1, L), 1).astype(jnp.float32)
    img = jnp.floor(lane / hw)
    pix = lane - img * hw
    rr = jnp.floor(pix / w)
    cc = pix - rr * w

    # --- 9 tap descriptors (lane shift + zero-pad mask), shared by both convs.
    # Masks use per-image coords, so they also kill cross-image leakage of the
    # circular roll.  Center tap (dy=dx=0) needs no mask.
    row_ok = {-1: rr >= 1.0, 0: None, 1: rr <= jnp.float32(h - 2)}
    col_ok = {-1: cc >= 1.0, 0: None, 1: cc <= jnp.float32(w - 2)}
    taps = []
    for dy in (-1, 0, 1):
        for dx in (-1, 0, 1):
            conds = [m for m in (row_ok[dy], col_ok[dx]) if m is not None]
            if not conds:
                mask = None
            elif len(conds) == 1:
                mask = conds[0].astype(jnp.float32)
            else:
                mask = (conds[0] & conds[1]).astype(jnp.float32)
            taps.append(((-(dy * w + dx)) % L, mask))

    def conv3x3_lrelu(inp, w_ref, bias):
        # Write each shifted+masked tap straight into its im2col rows
        # (8-row-aligned static stores; short tap live ranges), then one
        # (Cp, 9*Cp) x (9*Cp, L) MXU dot for the whole batch.
        for t, (shift, mask) in enumerate(taps):
            tap = inp if shift == 0 else pltpu.roll(inp, shift, axis=1)
            if mask is not None:
                tap = tap * mask                     # (1,L) mask broadcasts
            im_ref[t * cp:(t + 1) * cp, :] = tap
        y = jnp.dot(w_ref[...], im_ref[...],
                    preferred_element_type=jnp.float32) + bias
        return jnp.where(y > 0, y, jnp.float32(LEAKY_SLOPE) * y)

    def batchnorm(y, gamma, beta):
        # Training-mode BatchNorm2d: stats over (N,H,W) == the lane axis.
        mean = jnp.sum(y, axis=1, keepdims=True) * inv_cnt            # (Cp,1)
        centered = y - mean
        var = jnp.sum(centered * centered, axis=1, keepdims=True) * inv_cnt
        scale = gamma * jax.lax.rsqrt(var + jnp.float32(BN_EPS))      # (Cp,1)
        return centered * scale + beta

    x = x_ref[...]
    y = conv3x3_lrelu(x, w1_ref, bnp_ref[0])
    y = batchnorm(y, bnp_ref[1], bnp_ref[2])
    y = conv3x3_lrelu(y, w2_ref, bnp_ref[3])
    y = batchnorm(y, bnp_ref[4], bnp_ref[5])
    o_ref[...] = y


# ----------------------------------------------------------------------------
# One-time, host-side parameter packing (kept OUT of the jitted forward).
# ----------------------------------------------------------------------------
def pack_convblock_params(params, in_features, out_features):
    cp = max(_round_up(in_features, 8), _round_up(out_features, 8))

    def pack_w(w_hwio):
        _, _, ci, co = w_hwio.shape
        wt = jnp.transpose(w_hwio, (3, 0, 1, 2))                # (co,3,3,ci)
        wt = jnp.pad(wt, ((0, cp - co), (0, 0), (0, 0), (0, cp - ci)))
        return wt.reshape(cp, 9 * cp).astype(jnp.float32)       # (Cp, 9*Cp)

    def pad_col(v):
        return jnp.pad(v.astype(jnp.float32),
                       (0, cp - v.shape[0])).reshape(cp, 1)

    w1p = pack_w(params["w1"])
    w2p = pack_w(params["w2"])
    bnp = jnp.stack([pad_col(params["b1"]), pad_col(params["g1"]),
                     pad_col(params["beta1"]), pad_col(params["b2"]),
                     pad_col(params["g2"]), pad_col(params["beta2"])], axis=0)
    return w1p, w2p, bnp                                        # bnp: (6,Cp,1)


# ----------------------------------------------------------------------------
# Jitted forward: NCHW in / NCHW out; only thin layout plumbing + one kernel.
# ----------------------------------------------------------------------------
@functools.partial(jax.jit, static_argnames=("out_features",))
def convblock_forward(x_nchw, w1p, w2p, bnp, *, out_features):
    N, Cin, H, W = x_nchw.shape
    cp = w1p.shape[0]
    L = N * H * W

    # Channel-major, lane-dense layout: (Cp, N*H*W); lanes multiple of 128.
    xc = jnp.transpose(x_nchw, (1, 0, 2, 3)).reshape(Cin, L).astype(jnp.float32)
    xc = jnp.pad(xc, ((0, cp - Cin), (0, 0)))

    kernel = functools.partial(_convblock_kernel, n=N, cp=cp, h=H, w=W)
    full = lambda shape: pl.BlockSpec(shape, lambda i: (0,) * len(shape))

    out = pl.pallas_call(
        kernel,
        out_shape=jax.ShapeDtypeStruct((cp, L), jnp.float32),
        grid=(1,),
        in_specs=[
            full((cp, L)),           # x (channel-major, padded)
            full((cp, 9 * cp)),      # packed conv1 weights
            full((cp, 9 * cp)),      # packed conv2 weights
            full((6, cp, 1)),        # [b1, g1, beta1, b2, g2, beta2]
        ],
        out_specs=full((cp, L)),
        scratch_shapes=[pltpu.VMEM((9 * cp, L), jnp.float32)],  # shared im2col
        compiler_params=pltpu.CompilerParams(
            dimension_semantics=("arbitrary",)),
        # TODO(synk): for large N*H*W add a 'parallel' grid axis (second v7x
        # TensorCore) and H-tile with a 1-row halo / two-pass BN; also re-derive
        # the VMEM budget for v7x's 64 MiB. This toy shape fits everywhere.
    )(xc, w1p, w2p, bnp)

    out = out[:out_features].reshape(out_features, N, H, W)
    return jnp.transpose(out, (1, 0, 2, 3))


# ----------------------------------------------------------------------------
# Pure-JAX reference (NCHW, mirrors the PyTorch ops) for a correctness check.
# ----------------------------------------------------------------------------
def ref_convblock(x_nchw, params):
    def conv(x, w_hwio, b):
        w_oihw = jnp.transpose(w_hwio, (3, 2, 0, 1))
        y = jax.lax.conv_general_dilated(
            x, w_oihw, window_strides=(1, 1), padding=((1, 1), (1, 1)),
            dimension_numbers=("NCHW", "OIHW", "NCHW"))
        return y + b.reshape(1, -1, 1, 1)

    def lrelu(x):
        return jnp.where(x > 0, x, LEAKY_SLOPE * x)

    def bn(x, g, b):
        mean = jnp.mean(x, axis=(0, 2, 3), keepdims=True)
        var = jnp.mean((x - mean) ** 2, axis=(0, 2, 3), keepdims=True)
        return (x - mean) / jnp.sqrt(var + BN_EPS) * g.reshape(1, -1, 1, 1) \
               + b.reshape(1, -1, 1, 1)

    x = bn(lrelu(conv(x_nchw, params["w1"], params["b1"])),
           params["g1"], params["beta1"])
    x = bn(lrelu(conv(x, params["w2"], params["b2"])),
           params["g2"], params["beta2"])
    return x


if __name__ == "__main__":
    key = jax.random.PRNGKey(0)
    in_features, out_features = 4, 8
    N, H, W = 2, 16, 16

    k_x, k_w1, k_b1, k_w2, k_b2 = jax.random.split(key, 5)
    x = jax.random.normal(k_x, (N, in_features, H, W), jnp.float32)

    params = {
        # conv weights stored HWIO (3,3,Cin,Cout); PyTorch shape is OIHW.
        "w1": 0.2 * jax.random.normal(k_w1, (3, 3, in_features, out_features),
                                      jnp.float32),
        "b1": 0.1 * jax.random.normal(k_b1, (out_features,), jnp.float32),
        "g1": jnp.ones((out_features,), jnp.float32),      # BN gamma init = 1
        "beta1": jnp.zeros((out_features,), jnp.float32),  # BN beta  init = 0
        "w2": 0.2 * jax.random.normal(k_w2, (3, 3, out_features, out_features),
                                      jnp.float32),
        "b2": 0.1 * jax.random.normal(k_b2, (out_features,), jnp.float32),
        "g2": jnp.ones((out_features,), jnp.float32),
        "beta2": jnp.zeros((out_features,), jnp.float32),
    }

    # One-time weight/parameter packing (kept out of the per-step forward).
    w1p, w2p, bnp = pack_convblock_params(params, in_features, out_features)

    out = convblock_forward(x, w1p, w2p, bnp, out_features=out_features)
    out = jax.block_until_ready(out)

    ref = ref_convblock(x, params)
    assert out.shape == (N, out_features, H, W), out.shape
    assert jnp.allclose(out, ref, atol=1e-4, rtol=1e-4), \
        float(jnp.max(jnp.abs(out - ref)))

    print("KERNEL_OK")
</pallas_src>

<mosaic_0001>
module attributes {stable_mosaic.version = 11 : i64} {
  func.func @_convblock_kernel(%arg0: i32, %arg1: memref<8x512xf32, #tpu.memory_space<vmem>>, %arg2: memref<8x72xf32, #tpu.memory_space<vmem>>, %arg3: memref<8x72xf32, #tpu.memory_space<vmem>>, %arg4: memref<6x8x1xf32, #tpu.memory_space<vmem>>, %arg5: memref<8x512xf32, #tpu.memory_space<vmem>>, %arg6: memref<72x512xf32, #tpu.memory_space<vmem>>) attributes {dimension_semantics = [#tpu.dimension_semantics<arbitrary>], iteration_bounds = array<i64: 1>, scalar_prefetch = 0 : i64, scratch_operands = 1 : i64, tpu.core_type = #tpu.core_type<tc>, window_params = [{pipeline_mode = #tpu.pipeline_mode<synchronous>, transform_indices = @transform_0, window_bounds = array<i64: 8, 512>}, {pipeline_mode = #tpu.pipeline_mode<synchronous>, transform_indices = @transform_1, window_bounds = array<i64: 8, 72>}, {pipeline_mode = #tpu.pipeline_mode<synchronous>, transform_indices = @transform_2, window_bounds = array<i64: 8, 72>}, {pipeline_mode = #tpu.pipeline_mode<synchronous>, transform_indices = @transform_3, window_bounds = array<i64: 6, 8, 1>}, {pipeline_mode = #tpu.pipeline_mode<synchronous>, transform_indices = @transform_4, window_bounds = array<i64: 8, 512>}]} {
    %0 = tpu.iota {dimensions = array<i32: 1>} : vector<1x512xi32>
    %1 = arith.sitofp %0 : vector<1x512xi32> to vector<1x512xf32>
    %cst = arith.constant 2.560000e+02 : f32
    %2 = vector.broadcast %cst : f32 to vector<1x512xf32>
    %3 = arith.divf %1, %2 : vector<1x512xf32>
    %4 = math.floor %3 : vector<1x512xf32>
    %cst_0 = arith.constant 2.560000e+02 : f32
    %5 = vector.broadcast %cst_0 : f32 to vector<1x512xf32>
    %6 = arith.mulf %4, %5 : vector<1x512xf32>
    %7 = arith.subf %1, %6 : vector<1x512xf32>
    %cst_1 = arith.constant 1.600000e+01 : f32
    %8 = vector.broadcast %cst_1 : f32 to vector<1x512xf32>
    %9 = arith.divf %7, %8 : vector<1x512xf32>
    %10 = math.floor %9 : vector<1x512xf32>
    %cst_2 = arith.constant 1.600000e+01 : f32
    %11 = vector.broadcast %cst_2 : f32 to vector<1x512xf32>
    %12 = arith.mulf %10, %11 : vector<1x512xf32>
    %13 = arith.subf %7, %12 : vector<1x512xf32>
    %cst_3 = arith.constant 1.000000e+00 : f32
    %14 = vector.broadcast %cst_3 : f32 to vector<1x512xf32>
    %15 = arith.cmpf oge, %10, %14 : vector<1x512xf32>
    %cst_4 = arith.constant 1.400000e+01 : f32
    %16 = vector.broadcast %cst_4 : f32 to vector<1x512xf32>
    %17 = arith.cmpf ole, %10, %16 : vector<1x512xf32>
    %cst_5 = arith.constant 1.000000e+00 : f32
    %18 = vector.broadcast %cst_5 : f32 to vector<1x512xf32>
    %19 = arith.cmpf oge, %13, %18 : vector<1x512xf32>
    %cst_6 = arith.constant 1.400000e+01 : f32
    %20 = vector.broadcast %cst_6 : f32 to vector<1x512xf32>
    %21 = arith.cmpf ole, %13, %20 : vector<1x512xf32>
    %22 = arith.andi %15, %19 : vector<1x512xi1>
    %23 = arith.extui %22 : vector<1x512xi1> to vector<1x512xi32>
    %24 = arith.sitofp %23 : vector<1x512xi32> to vector<1x512xf32>
    %25 = arith.extui %15 : vector<1x512xi1> to vector<1x512xi32>
    %26 = arith.sitofp %25 : vector<1x512xi32> to vector<1x512xf32>
    %27 = arith.andi %15, %21 : vector<1x512xi1>
    %28 = arith.extui %27 : vector<1x512xi1> to vector<1x512xi32>
    %29 = arith.sitofp %28 : vector<1x512xi32> to vector<1x512xf32>
    %30 = arith.extui %19 : vector<1x512xi1> to vector<1x512xi32>
    %31 = arith.sitofp %30 : vector<1x512xi32> to vector<1x512xf32>
    %32 = arith.extui %21 : vector<1x512xi1> to vector<1x512xi32>
    %33 = arith.sitofp %32 : vector<1x512xi32> to vector<1x512xf32>
    %34 = arith.andi %17, %19 : vector<1x512xi1>
    %35 = arith.extui %34 : vector<1x512xi1> to vector<1x512xi32>
    %36 = arith.sitofp %35 : vector<1x512xi32> to vector<1x512xf32>
    %37 = arith.extui %17 : vector<1x512xi1> to vector<1x512xi32>
    %38 = arith.sitofp %37 : vector<1x512xi32> to vector<1x512xf32>
    %39 = arith.andi %17, %21 : vector<1x512xi1>
    %40 = arith.extui %39 : vector<1x512xi1> to vector<1x512xi32>
    %41 = arith.sitofp %40 : vector<1x512xi32> to vector<1x512xf32>
    %c0 = arith.constant 0 : index
    %c0_7 = arith.constant 0 : index
    %42 = vector.load %arg1[%c0, %c0_7] : memref<8x512xf32, #tpu.memory_space<vmem>>, vector<8x512xf32>
    %c0_8 = arith.constant 0 : index
    %c0_9 = arith.constant 0 : index
    %c0_10 = arith.constant 0 : index
    %43 = vector.load %arg4[%c0_8, %c0_9, %c0_10] : memref<6x8x1xf32, #tpu.memory_space<vmem>>, vector<1x8x1xf32>
    %44 = vector.shape_cast %43 : vector<1x8x1xf32> to vector<8x1xf32>
    %c17_i32 = arith.constant 17 : i32
    %45 = tpu.dynamic_rotate %42 by %c17_i32 dim 1 : vector<8x512xf32>, i32 -> vector<8x512xf32>
    %46 = vector.broadcast %24 : vector<1x512xf32> to vector<8x512xf32>
    %47 = arith.mulf %45, %46 : vector<8x512xf32>
    %c0_11 = arith.constant 0 : index
    %c0_12 = arith.constant 0 : index
    %48 = vector.load %arg6[%c0_11, %c0_12] : memref<72x512xf32, #tpu.memory_space<vmem>>, vector<8x512xf32>
    tpu.vector_store %arg6[%c0_11, %c0_12], %47 {strides = array<i32>} : memref<72x512xf32, #tpu.memory_space<vmem>>, vector<8x512xf32>,
    %c16_i32 = arith.constant 16 : i32
    %49 = tpu.dynamic_rotate %42 by %c16_i32 dim 1 : vector<8x512xf32>, i32 -> vector<8x512xf32>
    %50 = vector.broadcast %26 : vector<1x512xf32> to vector<8x512xf32>
    %51 = arith.mulf %49, %50 : vector<8x512xf32>
    %c8 = arith.constant 8 : index
    %c0_13 = arith.constant 0 : index
    %52 = vector.load %arg6[%c8, %c0_13] : memref<72x512xf32, #tpu.memory_space<vmem>>, vector<8x512xf32>
    tpu.vector_store %arg6[%c8, %c0_13], %51 {strides = array<i32>} : memref<72x512xf32, #tpu.memory_space<vmem>>, vector<8x512xf32>,
    %c15_i32 = arith.constant 15 : i32
    %53 = tpu.dynamic_rotate %42 by %c15_i32 dim 1 : vector<8x512xf32>, i32 -> vector<8x512xf32>
    %54 = vector.broadcast %29 : vector<1x512xf32> to vector<8x512xf32>
    %55 = arith.mulf %53, %54 : vector<8x512xf32>
    %c16 = arith.constant 16 : index
    %c0_14 = arith.constant 0 : index
    %56 = vector.load %arg6[%c16, %c0_14] : memref<72x512xf32, #tpu.memory_space<vmem>>, vector<8x512xf32>
    tpu.vector_store %arg6[%c16, %c0_14], %55 {strides = array<i32>} : memref<72x512xf32, #tpu.memory_space<vmem>>, vector<8x512xf32>,
    %c1_i32 = arith.constant 1 : i32
    %57 = tpu.dynamic_rotate %42 by %c1_i32 dim 1 : vector<8x512xf32>, i32 -> vector<8x512xf32>
    %58 = vector.broadcast %31 : vector<1x512xf32> to vector<8x512xf32>
    %59 = arith.mulf %57, %58 : vector<8x512xf32>
    %c24 = arith.constant 24 : index
    %c0_15 = arith.constant 0 : index
    %60 = vector.load %arg6[%c24, %c0_15] : memref<72x512xf32, #tpu.memory_space<vmem>>, vector<8x512xf32>
    tpu.vector_store %arg6[%c24, %c0_15], %59 {strides = array<i32>} : memref<72x512xf32, #tpu.memory_space<vmem>>, vector<8x512xf32>,
    %c32 = arith.constant 32 : index
    %c0_16 = arith.constant 0 : index
    %61 = vector.load %arg6[%c32, %c0_16] : memref<72x512xf32, #tpu.memory_space<vmem>>, vector<8x512xf32>
    tpu.vector_store %arg6[%c32, %c0_16], %42 {strides = array<i32>} : memref<72x512xf32, #tpu.memory_space<vmem>>, vector<8x512xf32>,
    %c511_i32 = arith.constant 511 : i32
    %62 = tpu.dynamic_rotate %42 by %c511_i32 dim 1 : vector<8x512xf32>, i32 -> vector<8x512xf32>
    %63 = vector.broadcast %33 : vector<1x512xf32> to vector<8x512xf32>
    %64 = arith.mulf %62, %63 : vector<8x512xf32>
    %c40 = arith.constant 40 : index
    %c0_17 = arith.constant 0 : index
    %65 = vector.load %arg6[%c40, %c0_17] : memref<72x512xf32, #tpu.memory_space<vmem>>, vector<8x512xf32>
    tpu.vector_store %arg6[%c40, %c0_17], %64 {strides = array<i32>} : memref<72x512xf32, #tpu.memory_space<vmem>>, vector<8x512xf32>,
    %c497_i32 = arith.constant 497 : i32
    %66 = tpu.dynamic_rotate %42 by %c497_i32 dim 1 : vector<8x512xf32>, i32 -> vector<8x512xf32>
    %67 = vector.broadcast %36 : vector<1x512xf32> to vector<8x512xf32>
    %68 = arith.mulf %66, %67 : vector<8x512xf32>
    %c48 = arith.constant 48 : index
    %c0_18 = arith.constant 0 : index
    %69 = vector.load %arg6[%c48, %c0_18] : memref<72x512xf32, #tpu.memory_space<vmem>>, vector<8x512xf32>
    tpu.vector_store %arg6[%c48, %c0_18], %68 {strides = array<i32>} : memref<72x512xf32, #tpu.memory_space<vmem>>, vector<8x512xf32>,
    %c496_i32 = arith.constant 496 : i32
    %70 = tpu.dynamic_rotate %42 by %c496_i32 dim 1 : vector<8x512xf32>, i32 -> vector<8x512xf32>
    %71 = vector.broadcast %38 : vector<1x512xf32> to vector<8x512xf32>
    %72 = arith.mulf %70, %71 : vector<8x512xf32>
    %c56 = arith.constant 56 : index
    %c0_19 = arith.constant 0 : index
    %73 = vector.load %arg6[%c56, %c0_19] : memref<72x512xf32, #tpu.memory_space<vmem>>, vector<8x512xf32>
    tpu.vector_store %arg6[%c56, %c0_19], %72 {strides = array<i32>} : memref<72x512xf32, #tpu.memory_space<vmem>>, vector<8x512xf32>,
    %c495_i32 = arith.constant 495 : i32
    %74 = tpu.dynamic_rotate %42 by %c495_i32 dim 1 : vector<8x512xf32>, i32 -> vector<8x512xf32>
    %75 = vector.broadcast %41 : vector<1x512xf32> to vector<8x512xf32>
    %76 = arith.mulf %74, %75 : vector<8x512xf32>
    %c64 = arith.constant 64 : index
    %c0_20 = arith.constant 0 : index
    %77 = vector.load %arg6[%c64, %c0_20] : memref<72x512xf32, #tpu.memory_space<vmem>>, vector<8x512xf32>
    tpu.vector_store %arg6[%c64, %c0_20], %76 {strides = array<i32>} : memref<72x512xf32, #tpu.memory_space<vmem>>, vector<8x512xf32>,
    %c0_21 = arith.constant 0 : index
    %c0_22 = arith.constant 0 : index
    %78 = vector.load %arg2[%c0_21, %c0_22] : memref<8x72xf32, #tpu.memory_space<vmem>>, vector<8x72xf32>
    %c0_23 = arith.constant 0 : index
    %c0_24 = arith.constant 0 : index
    %79 = vector.load %arg6[%c0_23, %c0_24] : memref<72x512xf32, #tpu.memory_space<vmem>>, vector<72x512xf32>
    %cst_25 = arith.constant dense<0.000000e+00> : vector<8x512xf32>
    %80 = tpu.matmul %78, %79, %cst_25 {dimension_numbers = #tpu.dot_dimension_numbers<[1], [0], [0], [1], [0, 0, 1, 1], [], []>} : vector<8x72xf32>, vector<72x512xf32>, vector<8x512xf32> -> vector<8x512xf32>
    %81 = vector.broadcast %44 : vector<8x1xf32> to vector<8x512xf32>
    %82 = arith.addf %80, %81 : vector<8x512xf32>
    %cst_26 = arith.constant 0.000000e+00 : f32
    %83 = vector.broadcast %cst_26 : f32 to vector<8x512xf32>
    %84 = arith.cmpf ogt, %82, %83 : vector<8x512xf32>
    %cst_27 = arith.constant 0.00999999977 : f32
    %85 = vector.broadcast %cst_27 : f32 to vector<8x512xf32>
    %86 = arith.mulf %85, %82 : vector<8x512xf32>
    %87 = arith.select %84, %82, %86 : vector<8x512xi1>, vector<8x512xf32>
    %c1 = arith.constant 1 : index
    %c0_28 = arith.constant 0 : index
    %c0_29 = arith.constant 0 : index
    %88 = vector.load %arg4[%c1, %c0_28, %c0_29] : memref<6x8x1xf32, #tpu.memory_space<vmem>>, vector<1x8x1xf32>
    %89 = vector.shape_cast %88 : vector<1x8x1xf32> to vector<8x1xf32>
    %c2 = arith.constant 2 : index
    %c0_30 = arith.constant 0 : index
    %c0_31 = arith.constant 0 : index
    %90 = vector.load %arg4[%c2, %c0_30, %c0_31] : memref<6x8x1xf32, #tpu.memory_space<vmem>>, vector<1x8x1xf32>
    %91 = vector.shape_cast %90 : vector<1x8x1xf32> to vector<8x1xf32>
    %cst_32 = arith.constant dense<0.000000e+00> : vector<8xf32>
    %92 = vector.multi_reduction <add>, %87, %cst_32 [1] : vector<8x512xf32> to vector<8xf32>
    %93 = vector.shape_cast %92 : vector<8xf32> to vector<8x1xf32>
    %cst_33 = arith.constant 0.001953125 : f32
    %94 = vector.broadcast %cst_33 : f32 to vector<8x1xf32>
    %95 = arith.mulf %93, %94 : vector<8x1xf32>
    %96 = vector.broadcast %95 : vector<8x1xf32> to vector<8x512xf32>
    %97 = arith.subf %87, %96 : vector<8x512xf32>
    %98 = arith.mulf %97, %97 : vector<8x512xf32>
    %cst_34 = arith.constant dense<0.000000e+00> : vector<8xf32>
    %99 = vector.multi_reduction <add>, %98, %cst_34 [1] : vector<8x512xf32> to vector<8xf32>
    %100 = vector.shape_cast %99 : vector<8xf32> to vector<8x1xf32>
    %cst_35 = arith.constant 0.001953125 : f32
    %101 = vector.broadcast %cst_35 : f32 to vector<8x1xf32>
    %102 = arith.mulf %100, %101 : vector<8x1xf32>
    %cst_36 = arith.constant 9.99999974E-6 : f32
    %103 = vector.broadcast %cst_36 : f32 to vector<8x1xf32>
    %104 = arith.addf %102, %103 : vector<8x1xf32>
    %105 = math.rsqrt %104 : vector<8x1xf32>
    %106 = arith.mulf %89, %105 : vector<8x1xf32>
    %107 = vector.broadcast %106 : vector<8x1xf32> to vector<8x512xf32>
    %108 = arith.mulf %97, %107 : vector<8x512xf32>
    %109 = vector.broadcast %91 : vector<8x1xf32> to vector<8x512xf32>
    %110 = arith.addf %108, %109 : vector<8x512xf32>
    %c3 = arith.constant 3 : index
    %c0_37 = arith.constant 0 : index
    %c0_38 = arith.constant 0 : index
    %111 = vector.load %arg4[%c3, %c0_37, %c0_38] : memref<6x8x1xf32, #tpu.memory_space<vmem>>, vector<1x8x1xf32>
    %112 = vector.shape_cast %111 : vector<1x8x1xf32> to vector<8x1xf32>
    %c17_i32_39 = arith.constant 17 : i32
    %113 = tpu.dynamic_rotate %110 by %c17_i32_39 dim 1 : vector<8x512xf32>, i32 -> vector<8x512xf32>
    %114 = vector.broadcast %24 : vector<1x512xf32> to vector<8x512xf32>
    %115 = arith.mulf %113, %114 : vector<8x512xf32>
    %c0_40 = arith.constant 0 : index
    %c0_41 = arith.constant 0 : index
    %116 = vector.load %arg6[%c0_40, %c0_41] : memref<72x512xf32, #tpu.memory_space<vmem>>, vector<8x512xf32>
    tpu.vector_store %arg6[%c0_40, %c0_41], %115 {strides = array<i32>} : memref<72x512xf32, #tpu.memory_space<vmem>>, vector<8x512xf32>,
    %c16_i32_42 = arith.constant 16 : i32
    %117 = tpu.dynamic_rotate %110 by %c16_i32_42 dim 1 : vector<8x512xf32>, i32 -> vector<8x512xf32>
    %118 = vector.broadcast %26 : vector<1x512xf32> to vector<8x512xf32>
    %119 = arith.mulf %117, %118 : vector<8x512xf32>
    %c8_43 = arith.constant 8 : index
    %c0_44 = arith.constant 0 : index
    %120 = vector.load %arg6[%c8_43, %c0_44] : memref<72x512xf32, #tpu.memory_space<vmem>>, vector<8x512xf32>
    tpu.vector_store %arg6[%c8_43, %c0_44], %119 {strides = array<i32>} : memref<72x512xf32, #tpu.memory_space<vmem>>, vector<8x512xf32>,
    %c15_i32_45 = arith.constant 15 : i32
    %121 = tpu.dynamic_rotate %110 by %c15_i32_45 dim 1 : vector<8x512xf32>, i32 -> vector<8x512xf32>
    %122 = vector.broadcast %29 : vector<1x512xf32> to vector<8x512xf32>
    %123 = arith.mulf %121, %122 : vector<8x512xf32>
    %c16_46 = arith.constant 16 : index
    %c0_47 = arith.constant 0 : index
    %124 = vector.load %arg6[%c16_46, %c0_47] : memref<72x512xf32, #tpu.memory_space<vmem>>, vector<8x512xf32>
    tpu.vector_store %arg6[%c16_46, %c0_47], %123 {strides = array<i32>} : memref<72x512xf32, #tpu.memory_space<vmem>>, vector<8x512xf32>,
    %c1_i32_48 = arith.constant 1 : i32
    %125 = tpu.dynamic_rotate %110 by %c1_i32_48 dim 1 : vector<8x512xf32>, i32 -> vector<8x512xf32>
    %126 = vector.broadcast %31 : vector<1x512xf32> to vector<8x512xf32>
    %127 = arith.mulf %125, %126 : vector<8x512xf32>
    %c24_49 = arith.constant 24 : index
    %c0_50 = arith.constant 0 : index
    %128 = vector.load %arg6[%c24_49, %c0_50] : memref<72x512xf32, #tpu.memory_space<vmem>>, vector<8x512xf32>
    tpu.vector_store %arg6[%c24_49, %c0_50], %127 {strides = array<i32>} : memref<72x512xf32, #tpu.memory_space<vmem>>, vector<8x512xf32>,
    %c32_51 = arith.constant 32 : index
    %c0_52 = arith.constant 0 : index
    %129 = vector.load %arg6[%c32_51, %c0_52] : memref<72x512xf32, #tpu.memory_space<vmem>>, vector<8x512xf32>
    tpu.vector_store %arg6[%c32_51, %c0_52], %110 {strides = array<i32>} : memref<72x512xf32, #tpu.memory_space<vmem>>, vector<8x512xf32>,
    %c511_i32_53 = arith.constant 511 : i32
    %130 = tpu.dynamic_rotate %110 by %c511_i32_53 dim 1 : vector<8x512xf32>, i32 -> vector<8x512xf32>
    %131 = vector.broadcast %33 : vector<1x512xf32> to vector<8x512xf32>
    %132 = arith.mulf %130, %131 : vector<8x512xf32>
    %c40_54 = arith.constant 40 : index
    %c0_55 = arith.constant 0 : index
    %133 = vector.load %arg6[%c40_54, %c0_55] : memref<72x512xf32, #tpu.memory_space<vmem>>, vector<8x512xf32>
    tpu.vector_store %arg6[%c40_54, %c0_55], %132 {strides = array<i32>} : memref<72x512xf32, #tpu.memory_space<vmem>>, vector<8x512xf32>,
    %c497_i32_56 = arith.constant 497 : i32
    %134 = tpu.dynamic_rotate %110 by %c497_i32_56 dim 1 : vector<8x512xf32>, i32 -> vector<8x512xf32>
    %135 = vector.broadcast %36 : vector<1x512xf32> to vector<8x512xf32>
    %136 = arith.mulf %134, %135 : vector<8x512xf32>
    %c48_57 = arith.constant 48 : index
    %c0_58 = arith.constant 0 : index
    %137 = vector.load %arg6[%c48_57, %c0_58] : memref<72x512xf32, #tpu.memory_space<vmem>>, vector<8x512xf32>
    tpu.vector_store %arg6[%c48_57, %c0_58], %136 {strides = array<i32>} : memref<72x512xf32, #tpu.memory_space<vmem>>, vector<8x512xf32>,
    %c496_i32_59 = arith.constant 496 : i32
    %138 = tpu.dynamic_rotate %110 by %c496_i32_59 dim 1 : vector<8x512xf32>, i32 -> vector<8x512xf32>
    %139 = vector.broadcast %38 : vector<1x512xf32> to vector<8x512xf32>
    %140 = arith.mulf %138, %139 : vector<8x512xf32>
    %c56_60 = arith.constant 56 : index
    %c0_61 = arith.constant 0 : index
    %141 = vector.load %arg6[%c56_60, %c0_61] : memref<72x512xf32, #tpu.memory_space<vmem>>, vector<8x512xf32>
    tpu.vector_store %arg6[%c56_60, %c0_61], %140 {strides = array<i32>} : memref<72x512xf32, #tpu.memory_space<vmem>>, vector<8x512xf32>,
    %c495_i32_62 = arith.constant 495 : i32
    %142 = tpu.dynamic_rotate %110 by %c495_i32_62 dim 1 : vector<8x512xf32>, i32 -> vector<8x512xf32>
    %143 = vector.broadcast %41 : vector<1x512xf32> to vector<8x512xf32>
    %144 = arith.mulf %142, %143 : vector<8x512xf32>
    %c64_63 = arith.constant 64 : index
    %c0_64 = arith.constant 0 : index
    %145 = vector.load %arg6[%c64_63, %c0_64] : memref<72x512xf32, #tpu.memory_space<vmem>>, vector<8x512xf32>
    tpu.vector_store %arg6[%c64_63, %c0_64], %144 {strides = array<i32>} : memref<72x512xf32, #tpu.memory_space<vmem>>, vector<8x512xf32>,
    %c0_65 = arith.constant 0 : index
    %c0_66 = arith.constant 0 : index
    %146 = vector.load %arg3[%c0_65, %c0_66] : memref<8x72xf32, #tpu.memory_space<vmem>>, vector<8x72xf32>
    %c0_67 = arith.constant 0 : index
    %c0_68 = arith.constant 0 : index
    %147 = vector.load %arg6[%c0_67, %c0_68] : memref<72x512xf32, #tpu.memory_space<vmem>>, vector<72x512xf32>
    %cst_69 = arith.constant dense<0.000000e+00> : vector<8x512xf32>
    %148 = tpu.matmul %146, %147, %cst_69 {dimension_numbers = #tpu.dot_dimension_numbers<[1], [0], [0], [1], [0, 0, 1, 1], [], []>} : vector<8x72xf32>, vector<72x512xf32>, vector<8x512xf32> -> vector<8x512xf32>
    %149 = vector.broadcast %112 : vector<8x1xf32> to vector<8x512xf32>
    %150 = arith.addf %148, %149 : vector<8x512xf32>
    %cst_70 = arith.constant 0.000000e+00 : f32
    %151 = vector.broadcast %cst_70 : f32 to vector<8x512xf32>
    %152 = arith.cmpf ogt, %150, %151 : vector<8x512xf32>
    %cst_71 = arith.constant 0.00999999977 : f32
    %153 = vector.broadcast %cst_71 : f32 to vector<8x512xf32>
    %154 = arith.mulf %153, %150 : vector<8x512xf32>
    %155 = arith.select %152, %150, %154 : vector<8x512xi1>, vector<8x512xf32>
    %c4 = arith.constant 4 : index
    %c0_72 = arith.constant 0 : index
    %c0_73 = arith.constant 0 : index
    %156 = vector.load %arg4[%c4, %c0_72, %c0_73] : memref<6x8x1xf32, #tpu.memory_space<vmem>>, vector<1x8x1xf32>
    %157 = vector.shape_cast %156 : vector<1x8x1xf32> to vector<8x1xf32>
    %c5 = arith.constant 5 : index
    %c0_74 = arith.constant 0 : index
    %c0_75 = arith.constant 0 : index
    %158 = vector.load %arg4[%c5, %c0_74, %c0_75] : memref<6x8x1xf32, #tpu.memory_space<vmem>>, vector<1x8x1xf32>
    %159 = vector.shape_cast %158 : vector<1x8x1xf32> to vector<8x1xf32>
    %cst_76 = arith.constant dense<0.000000e+00> : vector<8xf32>
    %160 = vector.multi_reduction <add>, %155, %cst_76 [1] : vector<8x512xf32> to vector<8xf32>
    %161 = vector.shape_cast %160 : vector<8xf32> to vector<8x1xf32>
    %cst_77 = arith.constant 0.001953125 : f32
    %162 = vector.broadcast %cst_77 : f32 to vector<8x1xf32>
    %163 = arith.mulf %161, %162 : vector<8x1xf32>
    %164 = vector.broadcast %163 : vector<8x1xf32> to vector<8x512xf32>
    %165 = arith.subf %155, %164 : vector<8x512xf32>
    %166 = arith.mulf %165, %165 : vector<8x512xf32>
    %cst_78 = arith.constant dense<0.000000e+00> : vector<8xf32>
    %167 = vector.multi_reduction <add>, %166, %cst_78 [1] : vector<8x512xf32> to vector<8xf32>
    %168 = vector.shape_cast %167 : vector<8xf32> to vector<8x1xf32>
    %cst_79 = arith.constant 0.001953125 : f32
    %169 = vector.broadcast %cst_79 : f32 to vector<8x1xf32>
    %170 = arith.mulf %168, %169 : vector<8x1xf32>
    %cst_80 = arith.constant 9.99999974E-6 : f32
    %171 = vector.broadcast %cst_80 : f32 to vector<8x1xf32>
    %172 = arith.addf %170, %171 : vector<8x1xf32>
    %173 = math.rsqrt %172 : vector<8x1xf32>
    %174 = arith.mulf %157, %173 : vector<8x1xf32>
    %175 = vector.broadcast %174 : vector<8x1xf32> to vector<8x512xf32>
    %176 = arith.mulf %165, %175 : vector<8x512xf32>
    %177 = vector.broadcast %159 : vector<8x1xf32> to vector<8x512xf32>
    %178 = arith.addf %176, %177 : vector<8x512xf32>
    %c0_81 = arith.constant 0 : index
    %c0_82 = arith.constant 0 : index
    %179 = vector.load %arg5[%c0_81, %c0_82] : memref<8x512xf32, #tpu.memory_space<vmem>>, vector<8x512xf32>
    tpu.vector_store %arg5[%c0_81, %c0_82], %178 {strides = array<i32>} : memref<8x512xf32, #tpu.memory_space<vmem>>, vector<8x512xf32>,
    return
  }
  func.func @transform_0(%arg0: i32) -> (i32, i32) {
    %c0_i32 = arith.constant 0 : i32
    %c0_i32_0 = arith.constant 0 : i32
    %c0_i32_1 = arith.constant 0 : i32
    return %c0_i32, %c0_i32_0 : i32, i32
  }
  func.func @transform_1(%arg0: i32) -> (i32, i32) {
    %c0_i32 = arith.constant 0 : i32
    %c0_i32_0 = arith.constant 0 : i32
    %c0_i32_1 = arith.constant 0 : i32
    return %c0_i32, %c0_i32_0 : i32, i32
  }
  func.func @transform_2(%arg0: i32) -> (i32, i32) {
    %c0_i32 = arith.constant 0 : i32
    %c0_i32_0 = arith.constant 0 : i32
    %c0_i32_1 = arith.constant 0 : i32
    return %c0_i32, %c0_i32_0 : i32, i32
  }
  func.func @transform_3(%arg0: i32) -> (i32, i32, i32) {
    %c0_i32 = arith.constant 0 : i32
    %c0_i32_0 = arith.constant 0 : i32
    %c0_i32_1 = arith.constant 0 : i32
    %c0_i32_2 = arith.constant 0 : i32
    return %c0_i32, %c0_i32_0, %c0_i32_1 : i32, i32, i32
  }
  func.func @transform_4(%arg0: i32) -> (i32, i32) {
    %c0_i32 = arith.constant 0 : i32
    %c0_i32_0 = arith.constant 0 : i32
    %c0_i32_1 = arith.constant 0 : i32
    return %c0_i32, %c0_i32_0 : i32, i32
  }
}

</mosaic_0001>

<bundles_post_ra>
// kernel: convblock_forward.1
= control target key start
LH: loop header
LB: loop body
LE: loop exit
PB: predicated region body
PF: predicated region fallthrough
CT: control target
= control target key end

     0   :  { %s969_s19 = smov 112   ;;  %s970_s20 = smov 111   ;;  %v975_v4 = vmov 256.0   ;;  %v977_v7 = vmov 16.0   ;;  %v17_v8 = vlaneseq  ;;  %v979_v57 = vmov 0.0   ;;  %s1664_s0 = inlined_call_operand.vmem [shape: f32[8,512], index: 0, kind: input, shape index: {}]   ;;  %s1665_s3 = inlined_call_operand.vmem [shape: f32[6,8,1], index: 3, kind: input, shape index: {}]   ;;  %s1666_s1 = inlined_call_operand.vmem [shape: f32[8,72], index: 1, kind: input, shape index: {}]   ;;  %s1667_s2 = inlined_call_operand.vmem [shape: f32[8,72], index: 2, kind: input, shape index: {}]   ;;  %s1668_s4 = inlined_call_operand.vmem [shape: f32[8,512], index: 4, kind: output, shape index: {}]  }
   0x1   :  { %v1009_v0 = vld [vmem:[%s1664_s0 + $0x10] sm:$0xff]  ;;  %v1014_v1 = vld [vmem:[%s1664_s0] sm:$0xff]  ;;  %v1025_v2 = vld [vmem:[%s1664_s0 + $0x18] sm:$0xff]  ;;  %s971_s23 = smov 113   ;;  %s972_s26 = smov 127   ;;  %961 = vrcp.f32 %v975_v4 }
   0x2   :  { %307 = vrot.lane.b32.xlu1 %v1009_v0, %s969_s19  ;;  %328 = vrot.lane.b32.xlu0 %v1009_v0, %s970_s20  ;;  %v1036_v3 = vld [vmem:[%s1664_s0 + $0x8] sm:$0xff]  ;;  %s973_s0 = smov 1   ;;  %s974_s27 = smov 15   ;;  %963 = vrcp.f32 %v977_v7  ;;  %v1074_v10 = vand.u32 127, %v17_v8 }
   0x3   :  { %324 = vrot.lane.b32.xlu2 %v1014_v1, %s970_s20  ;;  %s976_s28 = smov 16   ;;  %s978_s29 = smov 17  }
   0x4   :  { %v19_v13 = vadd.s32 128, %v1074_v10  ;;  %v22_v18 = vcvt.s32.f32 %v1074_v10  ;;  %v20_v21 = vadd.s32 256, %v1074_v10  ;;  %v21_v25 = vadd.s32 384, %v1074_v10 }
   0x5   :  { %vm332_vm7 = vcmp.lt.s32.totalorder %v1074_v10, 111  ;;  %vm1672_vm15 = vcmp.lt.s32.totalorder %v1074_v10, 112 }
   0x6   :  { %v23_v16 = vcvt.s32.f32 %v19_v13  ;;  %v24_v27 = vcvt.s32.f32 %v20_v21  ;;  %v25_v30 = vcvt.s32.f32 %v21_v25 }
   0x7   :  { %v962_v5 = vpop.eup %961 }
   0x8   :  { %v27_v6 = vmul.f32 256.0, %v962_v5  ;;  %v964_v11 = vpop.eup %963  ;;  %vm31_vm0 = vweird.f32 %v962_v5 }
   0x9   :  { %v50_v14 = vmul.f32 16.0, %v964_v11  ;;  %vm54_vm1 = vweird.f32 %v964_v11 }
   0xa   :  { %309 = vrot.lane.b32.xlu1 %v1025_v2, %s969_s19  ;;  %330 = vrot.lane.b32.xlu0 %v1025_v2, %s970_s20  ;;  %v28_v9 = vsub.f32 1.0, %v27_v6 }
   0xb   :  { %286 = vrot.lane.b32.xlu2 %v1009_v0, %s971_s23  ;;  %v51_v17 = vsub.f32 1.0, %v50_v14 }
   0xc   :  { %v29_v12 = vmul.f32 %v962_v5, %v28_v9 }
   0xd   :  { %v52_v23 = vmul.f32 %v964_v11, %v51_v17 }
   0xe   :  { %v30_v15 = vadd.f32 %v962_v5, %v29_v12 }
   0xf   :  { %v53_v29 = vadd.f32 %v964_v11, %v52_v23 }
  0x10   :  { %v32_v19 = vsel %vm31_vm0, %v962_v5, %v30_v15 }
  0x11   :  { %v33_v20 = vmul.f32 %v32_v19, %v22_v18  ;;  %v34_v22 = vmul.f32 %v32_v19, %v23_v16  ;;  %v35_v32 = vmul.f32 %v32_v19, %v24_v27  ;;  %v55_v34 = vsel %vm54_vm1, %v964_v11, %v53_v29 }
  0x12   :  { %288 = vrot.lane.b32.xlu0 %v1025_v2, %s971_s23  ;;  %303 = vrot.lane.b32.xlu1 %v1014_v1, %s969_s19  ;;  %v36_v35 = vmul.f32 %v32_v19, %v25_v30 }
  0x13   :  { %326 = vrot.lane.b32.xlu2 %v1036_v3, %s970_s20  ;;  %v37_v24 = vfloor.f32 %v33_v20  ;;  %v38_v28 = vfloor.f32 %v34_v22  ;;  %v39_v37 = vfloor.f32 %v35_v32 }
  0x14   :  { %v40_v39 = vfloor.f32 %v36_v35 }
  0x15   :  { %v41_v26 = vmul.f32 256.0, %v37_v24  ;;  %v42_v33 = vmul.f32 256.0, %v38_v28  ;;  %v43_v41 = vmul.f32 256.0, %v39_v37 }
  0x16   :  { %v44_v44 = vmul.f32 256.0, %v40_v39 }
  0x17   :  { %v45_v31 = vsub.f32 %v22_v18, %v41_v26  ;;  %v46_v38 = vsub.f32 %v23_v16, %v42_v33  ;;  %v47_v46 = vsub.f32 %v24_v27, %v43_v41 }
  0x18   :  { %v48_v48 = vsub.f32 %v25_v30, %v44_v44 }
  0x19   :  { %v56_v36 = vmul.f32 %v55_v34, %v45_v31  ;;  %v57_v43 = vmul.f32 %v55_v34, %v46_v38  ;;  %v58_v50 = vmul.f32 %v55_v34, %v47_v46 }
  0x1a   :  { %265 = vrot.lane.b32.xlu0 %v1009_v0, %s972_s26  ;;  %267 = vrot.lane.b32.xlu1 %v1025_v2, %s972_s26  ;;  %v59_v53 = vmul.f32 %v55_v34, %v48_v48 }
  0x1b   :  { %282 = vrot.lane.b32.xlu2 %v1014_v1, %s971_s23  ;;  %v1096_v40 = vfloor.f32 %v56_v36  ;;  %v1099_v47 = vfloor.f32 %v57_v43  ;;  %v1108_v54 = vfloor.f32 %v58_v50 }
  0x1c   :  { %v1116_v56 = vfloor.f32 %v59_v53 }
  0x1d   :  { %v64_v45 = vmul.f32 16.0, %v1096_v40  ;;  %v65_v52 = vmul.f32 16.0, %v1099_v47  ;;  %vm76_vm2 = vcmp.le.f32.partialorder %v1096_v40, 14.0  ;;  %v66_v59 = vmul.f32 16.0, %v1108_v54 }
  0x1e   :  { %vm77_vm5 = vcmp.le.f32.partialorder %v1099_v47, 14.0  ;;  %v67_v61 = vmul.f32 16.0, %v1116_v56  ;;  %vm78_vm9 = vcmp.le.f32.partialorder %v1108_v54, 14.0  ;;  %vm79_vm11 = vcmp.le.f32.partialorder %v1116_v56, 14.0 }
  0x1f   :  { %v1101_v49 = vsub.f32 %v45_v31, %v64_v45  ;;  %v1110_v55 = vsub.f32 %v46_v38, %v65_v52  ;;  %v1133_v4 = vsub.f32 %v47_v46, %v66_v59  ;;  %v1167_v17 = vsel %vm78_vm9, 1.0, %v979_v57 }
  0x20   :  { %v1135_v5 = vsub.f32 %v48_v48, %v67_v61  ;;  %v1196_v25 = vsel %vm79_vm11, 1.0, %v979_v57  ;;  %v1234_v43 = vsel %vm76_vm2, 1.0, %v979_v57  ;;  %v1239_v44 = vsel %vm77_vm5, 1.0, %v979_v57 }
  0x21   :  { %vm84_vm3 = vcmp.le.f32.partialorder %v1101_v49, 14.0  ;;  %vm85_vm6 = vcmp.le.f32.partialorder %v1110_v55, 14.0  ;;  %vm86_vm10 = vcmp.le.f32.partialorder %v1133_v4, 14.0  ;;  %vm82_vm0 = vcmp.ge.f32.partialorder %v1133_v4, 1.0 }
  0x22   :  { %305 = vrot.lane.b32.xlu0 %v1036_v3, %s969_s19  ;;  %261 = vrot.lane.b32.xlu1 %v1014_v1, %s972_s26  ;;  %vm156_vm4 = vmand %vm76_vm2, %vm84_vm3  ;;  %vm87_vm12 = vcmp.le.f32.partialorder %v1135_v5, 14.0  ;;  %vm83_vm1 = vcmp.ge.f32.partialorder %v1135_v5, 1.0  ;;  %v1215_v36 = vsel %vm86_vm10, 1.0, %v979_v57 }
  0x23   :  { %284 = vrot.lane.b32.xlu2 %v1036_v3, %s971_s23  ;;  %v1119_v58 = vsel %vm156_vm4, 1.0, %v979_v57  ;;  %vm157_vm8 = vmand %vm77_vm5, %vm85_vm6  ;;  %v1244_v45 = vsel %vm87_vm12, 1.0, %v979_v57 }
  0x24   :  { %v1138_v6 = vsel %vm157_vm8, 1.0, %v979_v57  ;;  %vm158_vm13 = vmand %vm78_vm9, %vm86_vm10  ;;  %vm1670_vm8 = vcmp.lt.s32.totalorder %v1074_v10, 113 }
  0x25   :  { %vm159_vm14 = vmand %vm79_vm11, %vm87_vm12  ;;  %v1159_v13 = vsel %vm158_vm13, 1.0, %v979_v57 }
  0x26   :  { %v1162_v14 = vsel %vm159_vm14, 1.0, %v979_v57  ;;  %vm138_vm4 = vmand %vm78_vm9, %vm82_vm0  ;;  %vm1669_vm9 = vcmp.lt.s32.totalorder %v1074_v10, 127  ;;  %vm80_vm14 = vcmp.ge.f32.partialorder %v1101_v49, 1.0 }
  0x27   :  { %vm139_vm13 = vmand %vm79_vm11, %vm83_vm1  ;;  %v1191_v24 = vsel %vm138_vm4, 1.0, %v979_v57  ;;  %vm81_vm11 = vcmp.ge.f32.partialorder %v1110_v55, 1.0 }
  0x28   :  { %v1206_v31 = vsel %vm139_vm13, 1.0, %v979_v57  ;;  %vm137_vm4 = vmand %vm77_vm5, %vm81_vm11  ;;  %vm74_vm5 = vcmp.ge.f32.partialorder %v1108_v54, 1.0 }
  0x29   :  { %vm136_vm13 = vmand %vm76_vm2, %vm80_vm14  ;;  %v1253_v52 = vsel %vm137_vm4, 1.0, %v979_v57  ;;  %vm1671_vm2 = vcmp.lt.s32.totalorder %v1074_v10, 1  ;;  %vm75_vm4 = vcmp.ge.f32.partialorder %v1116_v56, 1.0 }
  0x2a   :  { %238 = vrot.lane.b32.xlu0 %v1036_v3, %s973_s0  ;;  %240 = vrot.lane.b32.xlu1 %v1009_v0, %s973_s0  ;;  %v1250_v50 = vsel %vm136_vm13, 1.0, %v979_v57  ;;  %vm110_vm13 = vmand %vm74_vm5, %vm86_vm10  ;;  %vm202_vm10 = vcmp.lt.s32.totalorder %v1074_v10, 16 }
  0x2b   :  { %263 = vrot.lane.b32.xlu2 %v1036_v3, %s972_s26 }
  0x32   :  { %217 = vrot.lane.b32.xlu0 %v1036_v3, %s974_s27  ;;  %219 = vrot.lane.b32.xlu1 %v1009_v0, %s974_s27 }
  0x33   :  { %242 = vrot.lane.b32.xlu2 %v1025_v2, %s973_s0 }
  0x3a   :  { %196 = vrot.lane.b32.xlu0 %v1036_v3, %s976_s28  ;;  %198 = vrot.lane.b32.xlu1 %v1009_v0, %s976_s28 }
  0x3b   :  { %221 = vrot.lane.b32.xlu2 %v1025_v2, %s974_s27 }
  0x42   :  { %236 = vrot.lane.b32.xlu0 %v1014_v1, %s973_s0  ;;  %175 = vrot.lane.b32.xlu1 %v1036_v3, %s978_s29 }
  0x43   :  { %177 = vrot.lane.b32.xlu2 %v1009_v0, %s978_s29 }
  0x4a   :  { %200 = vrot.lane.b32.xlu0 %v1025_v2, %s976_s28  ;;  %215 = vrot.lane.b32.xlu1 %v1014_v1, %s974_s27 }
  0x4b   :  { %179 = vrot.lane.b32.xlu2 %v1025_v2, %s978_s29 }
  0x52   :  { %194 = vrot.lane.b32.xlu0 %v1014_v1, %s976_s28  ;;  %173 = vrot.lane.b32.xlu1 %v1014_v1, %s978_s29 }
  0x5d   :  { %v325_v42 = vpop.permute.xlu2 %324 }
  0x65   :  { %v1103_v51 = vpop.permute.xlu2 %286 }
  0x6d   :  { %v327_v60 = vpop.permute.xlu2 %326 }
  0x6e   :  { %v335_v62 = vsel %vm332_vm7, %v325_v42, %v327_v60 }
  0x6f   :  { %v337_v63 = vmul.f32 %v1119_v58, %v335_v62 }
  0x71   :  { %398 = vmatpush.msra.mxu0 %v337_v63 }
  0x74   :  { %v1140_v7 = vpop.permute.xlu1 %307  ;;  %v329_v8 = vpop.permute.xlu0 %328 }
  0x75   :  { %v334_v9 = vsel %vm332_vm7, %v327_v60, %v329_v8  ;;  %v283_v12 = vpop.permute.xlu2 %282 }
  0x76   :  { %v338_v11 = vmul.f32 %v1138_v6, %v334_v9 }
  0x78   :  { %418 = vmatpush.msra.mxu1 %v338_v11  ;;  %v1279_v11 = vsel %vm85_vm6, 1.0, %v979_v57 }
  0x7c   :  { %v310_v15 = vpop.permute.xlu1 %309  ;;  %v331_v16 = vpop.permute.xlu0 %330 }
  0x7d   :  { %v312_v18 = vsel %vm1672_vm15, %v1140_v7, %v310_v15  ;;  %v333_v19 = vsel %vm332_vm7, %v329_v8, %v331_v16  ;;  %v336_v20 = vsel %vm332_vm7, %v331_v16, %v325_v42  ;;  %v285_v32 = vpop.permute.xlu2 %284 }
  0x7e   :  { %v339_v21 = vmul.f32 %v1159_v13, %v333_v19  ;;  %v340_v22 = vmul.f32 %v1162_v14, %v336_v20  ;;  %v318_v23 = vmul.f32 %v1167_v17, %v312_v18  ;;  %v292_v46 = vsel %vm1670_vm8, %v285_v32, %v1103_v51 }
  0x7f   :  { %v293_v53 = vsel %vm1670_vm8, %v283_v12, %v285_v32  ;;  %v1291_v20 = vsel %vm82_vm0, 1.0, %v979_v57 }
  0x80   :  { %438 = vmatpush.msra.mxu2 %v339_v21  ;;  %458 = vmatpush.msra.mxu3 %v340_v22  ;;  %v1297_v21 = vsel %vm83_vm1, 1.0, %v979_v57 }
  0x82   :  { %439 = vmatpush.msra.mxu2 %v318_v23 }
  0x84   :  { %v289_v26 = vpop.permute.xlu0 %288  ;;  %v304_v27 = vpop.permute.xlu1 %303 }
  0x85   :  { %v291_v28 = vsel %vm1670_vm8, %v1103_v51, %v289_v26  ;;  %v294_v29 = vsel %vm1670_vm8, %v289_v26, %v283_v12  ;;  %v315_v30 = vsel %vm1672_vm15, %v310_v15, %v304_v27  ;;  %v264_v42 = vpop.permute.xlu2 %263  ;;  %v295_v12 = vmul.f32 %v1250_v50, %v293_v53 }
  0x86   :  { %v297_v33 = vmul.f32 %v1191_v24, %v291_v28  ;;  %v319_v34 = vmul.f32 %v1196_v25, %v315_v30  ;;  %v298_v35 = vmul.f32 %v1206_v31, %v294_v29  ;;  %v296_v15 = vmul.f32 %v1253_v52, %v292_v46 }
  0x87   :  { %vm223_vm8 = vcmp.lt.s32.totalorder %v1074_v10, 15  ;;  %v1320_v30 = vsel %vm110_vm13, 1.0, %v979_v57  ;;  %v980_v46 = vmov 0  }
  0x88   :  { %440 = vmatpush.msra.mxu2 %v297_v33  ;;  %459 = vmatpush.msra.mxu3 %v319_v34 }
  0x89   :  { %959 = vset.pattern.permute.xlu2 %v980_v46  ;;  %960 = vset.pattern.permute.xlu0 %v980_v46 }
  0x8a   :  { %460 = vmatpush.msra.mxu3 %v298_v35 }
  0x8c   :  { %v266_v37 = vpop.permute.xlu0 %265  ;;  %v268_v38 = vpop.permute.xlu1 %267 }
  0x8d   :  { %v270_v39 = vsel %vm1669_vm9, %v266_v37, %v268_v38  ;;  %v271_v8 = vsel %vm1669_vm9, %v264_v42, %v266_v37  ;;  %v1283_v16 = vpop.permute.xlu2 %242 }
  0x8e   :  { %v276_v41 = vmul.f32 %v1215_v36, %v270_v39  ;;  %v275_v19 = vmul.f32 %v1279_v11, %v271_v8  ;;  %v172_v39 = vld [vmem:[%s1665_s3] sm:$0xff] }
  0x8f   :  { %384 = vperm.xlu2 %959, %v172_v39  }
  0x90   :  { %441 = vmatpush.msra.mxu2 %v276_v41 }
  0x92   :  { %442 = vmatpush.msra.mxu2 %v1009_v0 }
  0x94   :  { %v306_v0 = vpop.permute.xlu0 %305  ;;  %v262_v48 = vpop.permute.xlu1 %261 }
  0x95   :  { %v313_v59 = vsel %vm1672_vm15, %v306_v0, %v1140_v7  ;;  %v314_v60 = vsel %vm1672_vm15, %v304_v27, %v306_v0  ;;  %v273_v51 = vsel %vm1669_vm9, %v268_v38, %v262_v48  ;;  %v272_v9 = vsel %vm1669_vm9, %v262_v48, %v264_v42  ;;  %vm111_vm9 = vmand %vm75_vm4, %vm87_vm12  ;;  %v222_v29 = vpop.permute.xlu2 %221 }
  0x96   :  { %v316_v61 = vmul.f32 %v1234_v43, %v314_v60  ;;  %v317_v62 = vmul.f32 %v1239_v44, %v313_v59  ;;  %v277_v63 = vmul.f32 %v1244_v45, %v273_v51  ;;  %v1274_v7 = vsel %vm84_vm3, 1.0, %v979_v57  ;;  %vm90_vm12 = vmand %vm74_vm5, %vm82_vm0  ;;  %v939_v59 = vld [vmem:[%s1665_s3 + $0x10] sm:$0xff] }
  0x97   :  { %v274_v18 = vmul.f32 %v1274_v7, %v272_v9  ;;  %v1335_v38 = vsel %vm74_vm5, 1.0, %v979_v57  ;;  %v1357_v60 = vsel %vm80_vm14, 1.0, %v979_v57  ;;  %v1362_v51 = vsel %vm81_vm11, 1.0, %v979_v57  ;;  %530 = vperm.xlu2 %959, %v939_v59   ;;  %vm91_vm15 = vmand %vm75_vm4, %vm83_vm1 }
  0x98   :  { %399 = vmatpush.msra.mxu0 %v316_v61  ;;  %419 = vmatpush.msra.mxu1 %v317_v62  ;;  %v1365_v54 = vsel %vm90_vm12, 1.0, %v979_v57  ;;  %vm72_vm0 = vcmp.ge.f32.partialorder %v1096_v40, 1.0  ;;  %vm73_vm5 = vcmp.ge.f32.partialorder %v1099_v47, 1.0  ;;  %vm387_vm12 = vcmask 588800  }
  0x99   :  { %461 = vmatpush.msra.mxu3 %v277_v63  ;;  %vm108_vm13 = vmand %vm72_vm0, %vm84_vm3  ;;  %v1437_v49 = vsel %vm73_vm5, 1.0, %v979_v57 }
  0x9a   :  { %400 = vmatpush.msra.mxu0 %v295_v12  ;;  %420 = vmatpush.msra.mxu1 %v296_v15  ;;  %vm88_vm3 = vmand %vm72_vm0, %vm80_vm14 }
  0x9b   :  { %462 = vmatpush.msra.mxu3 %v1025_v2  ;;  %v1441_v55 = vsel %vm88_vm3, 1.0, %v979_v57 }
  0x9c   :  { %v239_v22 = vpop.permute.xlu0 %238  ;;  %v241_v23 = vpop.permute.xlu1 %240  ;;  %401 = vmatpush.msra.mxu0 %v274_v18  ;;  %421 = vmatpush.msra.mxu1 %v275_v19  ;;  %v1396_v19 = vsel %vm108_vm13, 1.0, %v979_v57  ;;  %vm1674_vm13 = vcmp.lt.s32.totalorder %v1074_v10, 113 }
  0x9d   :  { %v246_v26 = vsel %vm1671_vm2, %v239_v22, %v241_v23  ;;  %v245_v27 = vsel %vm1671_vm2, %v241_v23, %v1283_v16  ;;  %v178_v53 = vpop.permute.xlu2 %177  ;;  %v1404_v23 = vsel %vm75_vm4, 1.0, %v979_v57 }
  0x9e   :  { %v251_v2 = vmul.f32 %v1291_v20, %v246_v26  ;;  %v252_v28 = vmul.f32 %v1297_v21, %v245_v27  ;;  %402 = vmatpush.msra.mxu0 %v1014_v1  ;;  %422 = vmatpush.msra.mxu1 %v1036_v3  ;;  %v1323_v1 = vsel %vm111_vm9, 1.0, %v979_v57  ;;  %vm181_vm9 = vcmp.lt.s32.totalorder %v1074_v10, 17 }
  0xa0   :  { %443 = vmatpush.msra.mxu2 %v251_v2  ;;  %463 = vmatpush.msra.mxu3 %v252_v28 }
  0xa4   :  { %v218_v3 = vpop.permute.xlu0 %217  ;;  %v220_v32 = vpop.permute.xlu1 %219 }
  0xa5   :  { %v225_v33 = vsel %vm223_vm8, %v218_v3, %v220_v32  ;;  %v224_v34 = vsel %vm223_vm8, %v220_v32, %v222_v29  ;;  %v180_v18 = vpop.permute.xlu2 %179  ;;  %v1413_v32 = vsel %vm91_vm15, 1.0, %v979_v57 }
  0xa6   :  { %v230_v35 = vmul.f32 %v1320_v30, %v225_v33  ;;  %v231_v37 = vmul.f32 %v1323_v1, %v224_v34  ;;  %v182_v33 = vsel %vm181_vm9, %v178_v53, %v180_v18 }
  0xa8   :  { %444 = vmatpush.msra.mxu2 %v230_v35  ;;  %464 = vmatpush.msra.mxu3 %v231_v37 }
  0xac   :  { %v1340_v41 = vpop.permute.xlu0 %196  ;;  %v199_v42 = vpop.permute.xlu1 %198 }
  0xad   :  { %v204_v0 = vsel %vm202_vm10, %v1340_v41, %v199_v42 }
  0xae   :  { %v209_v48 = vmul.f32 %v1335_v38, %v204_v0 }
  0xb0   :  { %445 = vmatpush.msra.mxu2 %v209_v48 }
  0xb4   :  { %v237_v4 = vpop.permute.xlu0 %236  ;;  %v176_v61 = vpop.permute.xlu1 %175 }
  0xb5   :  { %v247_v62 = vsel %vm1671_vm2, %v237_v4, %v239_v22  ;;  %v248_v63 = vsel %vm1671_vm2, %v1283_v16, %v237_v4  ;;  %v183_v8 = vsel %vm181_vm9, %v176_v61, %v178_v53  ;;  %v345_v16 = vld [vmem:[%s1666_s1] sm:$0xff]  ;;  %vm109_vm2 = vmand %vm73_vm5, %vm85_vm6 }
  0xb6   :  { %v249_v9 = vmul.f32 %v1357_v60, %v248_v63  ;;  %v250_v12 = vmul.f32 %v1362_v51, %v247_v62  ;;  %v188_v15 = vmul.f32 %v1365_v54, %v183_v8  ;;  %v1399_v22 = vsel %vm109_vm2, 1.0, %v979_v57  ;;  %vm89_vm6 = vmand %vm73_vm5, %vm81_vm11 }
  0xb7   :  { %vm1673_vm5 = vcmp.lt.s32.totalorder %v1074_v10, 112 }
  0xb8   :  { %403 = vmatpush.msra.mxu0 %v249_v9  ;;  %423 = vmatpush.msra.mxu1 %v250_v12  ;;  %vm1675_vm3 = vmmov %vm1673_vm5 }
  0xb9   :  { %446 = vmatpush.msra.mxu2 %v188_v15 }
  0xba   :  { %936 = vmatmul.msk.f32.vlgmr.msra.gmra.mxu2 %vm387_vm12, %v345_v16 }
  0xbc   :  { %v201_v26 = vpop.permute.xlu0 %200  ;;  %v216_v27 = vpop.permute.xlu1 %215 }
  0xbd   :  { %v203_v5 = vsel %vm202_vm10, %v199_v42, %v201_v26  ;;  %v226_v2 = vsel %vm223_vm8, %v216_v27, %v218_v3  ;;  %v227_v28 = vsel %vm223_vm8, %v222_v29, %v216_v27  ;;  %v189_v29 = vmul.f32 %v1413_v32, %v182_v33 }
  0xbe   :  { %v228_v56 = vmul.f32 %v1396_v19, %v227_v28  ;;  %v229_v34 = vmul.f32 %v1399_v22, %v226_v2  ;;  %v210_v35 = vmul.f32 %v1404_v23, %v203_v5  ;;  %v1432_v3 = vsel %vm72_vm0, 1.0, %v979_v57 }
  0xbf   :  { %v1444_v42 = vsel %vm89_vm6, 1.0, %v979_v57  ;;  %vm1676_vm6 = vmmov %vm1674_vm13 }
  0xc0   :  { %404 = vmatpush.msra.mxu0 %v228_v56  ;;  %424 = vmatpush.msra.mxu1 %v229_v34 }
  0xc1   :  { %465 = vmatpush.msra.mxu3 %v210_v35 }
  0xc3   :  { %466 = vmatpush.msra.mxu3 %v189_v29 }
  0xc4   :  { %937 = vmatmul.msk.f32.vlgmr.msra.gmra.mxu3 %vm387_vm12, %v345_v16  ;;  %v195_v37 = vpop.permute.xlu0 %194  ;;  %v174_v39 = vpop.permute.xlu1 %173 }
  0xc5   :  { %v205_v40 = vsel %vm202_vm10, %v195_v37, %v1340_v41  ;;  %v206_v46 = vsel %vm202_vm10, %v201_v26, %v195_v37  ;;  %v184_v47 = vsel %vm181_vm9, %v174_v39, %v176_v61  ;;  %v185_v0 = vsel %vm181_vm9, %v180_v18, %v174_v39 }
  0xc6   :  { %v207_v48 = vmul.f32 %v1432_v3, %v206_v46  ;;  %v208_v53 = vmul.f32 %v1437_v49, %v205_v40  ;;  %v186_v57 = vmul.f32 %v1441_v55, %v185_v0  ;;  %v187_v59 = vmul.f32 %v1444_v42, %v184_v47 }
  0xc8   :  { %405 = vmatpush.msra.mxu0 %v207_v48  ;;  %425 = vmatpush.msra.mxu1 %v208_v53 }
  0xca   :  { %406 = vmatpush.msra.mxu0 %v186_v57  ;;  %426 = vmatpush.msra.mxu1 %v187_v59 }
  0xcb   :  { %934 = vmatmul.msk.f32.vlgmr.msra.gmra.mxu0 %vm387_vm12, %v345_v16  ;;  %935 = vmatmul.msk.f32.vlgmr.msra.gmra.mxu1 %vm387_vm12, %v345_v16 }
  0xe9   :  { %v385_v4 = vpop.permute.xlu2 %384 }
 0x13d   :  { %v448_v41 = vpop.f32.mrf.mxu2 }
 0x13e   :  { %v449_v61 = vadd.f32 %v448_v41, %v385_v4 }
 0x140   :  { %v477_v18 = vmul.f32 0.01, %v449_v61  ;;  %vm473_vm11 = vcmp.gt.f32.partialorder %v449_v61, 0.0 }
 0x142   :  { %v481_v33 = vsel %vm473_vm11, %v449_v61, %v477_v18 }
 0x147   :  { %v468_v62 = vpop.f32.mrf.mxu3 }
 0x148   :  { %v408_v63 = vpop.f32.mrf.mxu0  ;;  %v428_v8 = vpop.f32.mrf.mxu1  ;;  %v469_v9 = vadd.f32 %v468_v62, %v385_v4 }
 0x149   :  { %v409_v12 = vadd.f32 %v408_v63, %v385_v4  ;;  %v429_v15 = vadd.f32 %v428_v8, %v385_v4 }
 0x14a   :  { %v478_v5 = vmul.f32 0.01, %v469_v9  ;;  %vm474_vm14 = vcmp.gt.f32.partialorder %v469_v9, 0.0 }
 0x14b   :  { %vm471_vm15 = vcmp.gt.f32.partialorder %v409_v12, 0.0  ;;  %v475_v26 = vmul.f32 0.01, %v409_v12  ;;  %vm472_vm1 = vcmp.gt.f32.partialorder %v429_v15, 0.0  ;;  %v476_v27 = vmul.f32 0.01, %v429_v15 }
 0x14c   :  { %v482_v34 = vsel %vm474_vm14, %v469_v9, %v478_v5  ;;  %vm1681_vm14 = vmmov %vm1675_vm3 }
 0x14d   :  { %v479_v2 = vsel %vm471_vm15, %v409_v12, %v475_v26  ;;  %v480_v28 = vsel %vm472_vm1, %v429_v15, %v476_v27  ;;  %v938_v26 = vld [vmem:[%s1665_s3 + $0x8] sm:$0xff]  ;;  %vm1679_vm1 = vmmov %vm1676_vm6 }
 0x14e   :  { %v487_v16 = vadd.f32 %v480_v28, %v479_v2  ;;  %vm1680_vm11 = vmmov %vm1679_vm1 }
 0x150   :  { %v488_v56 = vadd.f32 %v487_v16, %v481_v33 }
 0x152   :  { %v489_v35 = vadd.f32 %v488_v56, %v482_v34 }
 0x154   :  { %490 = vadd.xlane.f32.xlu0 %v489_v35 }
 0x1c7   :  { %v491_v29 = vpop.xlane.xlu0 %490 }
 0x1c8   :  { %v492_v37 = vmul.f32 0.001953125, %v491_v29 }
 0x1ca   :  { %v493_v39 = vsub.f32 %v479_v2, %v492_v37  ;;  %v494_v40 = vsub.f32 %v480_v28, %v492_v37  ;;  %v495_v46 = vsub.f32 %v481_v33, %v492_v37  ;;  %v496_v47 = vsub.f32 %v482_v34, %v492_v37  ;;  %v531_v28 = vpop.permute.xlu2 %530 }
 0x1cc   :  { %v497_v0 = vmul.f32 %v493_v39, %v493_v39  ;;  %v498_v48 = vmul.f32 %v494_v40, %v494_v40  ;;  %v499_v53 = vmul.f32 %v495_v46, %v495_v46  ;;  %v500_v59 = vmul.f32 %v496_v47, %v496_v47 }
 0x1ce   :  { %v501_v57 = vadd.f32 %v498_v48, %v497_v0 }
 0x1d0   :  { %v502_v41 = vadd.f32 %v501_v57, %v499_v53 }
 0x1d2   :  { %v503_v4 = vadd.f32 %v502_v41, %v500_v59 }
 0x1d4   :  { %504 = vadd.xlane.f32.xlu1 %v503_v4 }
 0x247   :  { %v505_v62 = vpop.xlane.xlu1 %504 }
 0x248   :  { %v506_v61 = vmul.f32 0.001953125, %v505_v62 }
 0x24a   :  { %v507_v63 = vadd.f32 1e-05, %v506_v61 }
 0x24c   :  { %965 = vrsqrt.f32 %v507_v63  ;;  %vm514_vm4 = vweird.f32 %v507_v63 }
 0x252   :  { %v966_v8 = vpop.eup %965 }
 0x253   :  { %v509_v9 = vmul.f32 %v966_v8, %v507_v63  ;;  %vm515_vm2 = vweird.f32 %v966_v8 }
 0x254   :  { %vm516_vm0 = vmor %vm514_vm4, %vm515_vm2 }
 0x255   :  { %v510_v12 = vmul.f32 %v966_v8, %v509_v9  ;;  %vm1682_vm2 = vmmov %vm1675_vm3 }
 0x257   :  { %v511_v15 = vmul.f32 0.5, %v510_v12 }
 0x259   :  { %v512_v18 = vsub.f32 1.5, %v511_v15 }
 0x25b   :  { %v513_v27 = vmul.f32 %v966_v8, %v512_v18 }
 0x25d   :  { %v517_v5 = vsel %vm516_vm0, %v966_v8, %v513_v27 }
 0x25e   :  { %v518_v2 = vmul.f32 %v938_v26, %v517_v5 }
 0x260   :  { %521 = vperm.xlu2 %959, %v518_v2  }
 0x2ba   :  { %v522_v16 = vpop.permute.xlu2 %521 }
 0x2bb   :  { %v524_v33 = vmul.f32 %v522_v16, %v493_v39  ;;  %v526_v56 = vmul.f32 %v522_v16, %v495_v46  ;;  %v527_v29 = vmul.f32 %v522_v16, %v496_v47  ;;  %v525_v37 = vmul.f32 %v522_v16, %v494_v40 }
 0x2bd   :  { %v1464_v34 = vadd.f32 %v531_v28, %v524_v33  ;;  %v1466_v35 = vadd.f32 %v531_v28, %v526_v56  ;;  %v1474_v0 = vadd.f32 %v531_v28, %v527_v29  ;;  %v1476_v48 = vadd.f32 %v531_v28, %v525_v37 }
 0x2bf   :  { %647 = vrot.lane.b32.xlu1 %v1466_v35, %s971_s23  ;;  %687 = vrot.lane.b32.xlu2 %v1466_v35, %s970_s20 }
 0x2c0   :  { %683 = vrot.lane.b32.xlu0 %v1464_v34, %s970_s20 }
 0x2c7   :  { %629 = vrot.lane.b32.xlu1 %v1474_v0, %s972_s26  ;;  %689 = vrot.lane.b32.xlu2 %v1474_v0, %s970_s20 }
 0x2c8   :  { %685 = vrot.lane.b32.xlu0 %v1476_v48, %s970_s20 }
 0x2cf   :  { %667 = vrot.lane.b32.xlu2 %v1466_v35, %s969_s19  ;;  %623 = vrot.lane.b32.xlu1 %v1464_v34, %s972_s26 }
 0x2d0   :  { %643 = vrot.lane.b32.xlu0 %v1464_v34, %s971_s23 }
 0x2d7   :  { %669 = vrot.lane.b32.xlu2 %v1474_v0, %s969_s19  ;;  %603 = vrot.lane.b32.xlu1 %v1466_v35, %s973_s0 }
 0x2d8   :  { %645 = vrot.lane.b32.xlu0 %v1476_v48, %s971_s23 }
 0x2df   :  { %649 = vrot.lane.b32.xlu2 %v1474_v0, %s971_s23  ;;  %583 = vrot.lane.b32.xlu1 %v1466_v35, %s974_s27 }
 0x2e0   :  { %625 = vrot.lane.b32.xlu0 %v1476_v48, %s972_s26 }
 0x2e7   :  { %563 = vrot.lane.b32.xlu1 %v1466_v35, %s976_s28  ;;  %663 = vrot.lane.b32.xlu2 %v1464_v34, %s969_s19 }
 0x2e8   :  { %605 = vrot.lane.b32.xlu0 %v1474_v0, %s973_s0 }
 0x2ef   :  { %541 = vrot.lane.b32.xlu1 %v1476_v48, %s978_s29  ;;  %627 = vrot.lane.b32.xlu2 %v1466_v35, %s972_s26 }
 0x2f0   :  { %585 = vrot.lane.b32.xlu0 %v1474_v0, %s974_s27 }
 0x2f7   :  { %579 = vrot.lane.b32.xlu1 %v1464_v34, %s974_s27  ;;  %665 = vrot.lane.b32.xlu2 %v1476_v48, %s969_s19 }
 0x2f8   :  { %543 = vrot.lane.b32.xlu0 %v1466_v35, %s978_s29 }
 0x2ff   :  { %539 = vrot.lane.b32.xlu1 %v1464_v34, %s978_s29  ;;  %601 = vrot.lane.b32.xlu2 %v1476_v48, %s973_s0 }
 0x300   :  { %545 = vrot.lane.b32.xlu0 %v1474_v0, %s978_s29 }
 0x307   :  { %581 = vrot.lane.b32.xlu2 %v1476_v48, %s974_s27 }
 0x30f   :  { %561 = vrot.lane.b32.xlu2 %v1476_v48, %s976_s28 }
 0x317   :  { %599 = vrot.lane.b32.xlu2 %v1464_v34, %s973_s0 }
 0x319   :  { %v688_v39 = vpop.permute.xlu2 %687 }
 0x31f   :  { %565 = vrot.lane.b32.xlu2 %v1474_v0, %s976_s28 }
 0x321   :  { %v690_v40 = vpop.permute.xlu2 %689 }
 0x322   :  { %v691_v46 = vsel %vm332_vm7, %v688_v39, %v690_v40 }
 0x323   :  { %v697_v47 = vmul.f32 %v1159_v13, %v691_v46 }
 0x325   :  { %795 = vmatpush.msrb.mxu2 %v697_v47 }
 0x327   :  { %559 = vrot.lane.b32.xlu2 %v1464_v34, %s976_s28 }
 0x329   :  { %v668_v53 = vpop.permute.xlu2 %667 }
 0x331   :  { %v648_v57 = vpop.permute.xlu1 %647  ;;  %v670_v59 = vpop.permute.xlu2 %669 }
 0x332   :  { %v671_v41 = vsel %vm1673_vm5, %v668_v53, %v670_v59  ;;  %v684_v4 = vpop.permute.xlu0 %683  ;;  %vm1685_vm5 = vcmp.lt.s32.totalorder %v1074_v10, 1 }
 0x333   :  { %v694_v62 = vsel %vm332_vm7, %v690_v40, %v684_v4  ;;  %v677_v61 = vmul.f32 %v1167_v17, %v671_v41 }
 0x334   :  { %v698_v63 = vmul.f32 %v1162_v14, %v694_v62 }
 0x335   :  { %796 = vmatpush.msrb.mxu2 %v677_v61 }
 0x336   :  { %815 = vmatpush.msrb.mxu3 %v698_v63 }
 0x339   :  { %v630_v13 = vpop.permute.xlu1 %629  ;;  %v650_v8 = vpop.permute.xlu2 %649 }
 0x33a   :  { %v651_v9 = vsel %vm1674_vm13, %v648_v57, %v650_v8  ;;  %v686_v12 = vpop.permute.xlu0 %685  ;;  %vm1686_vm13 = vmmov %vm1685_vm5 }
 0x33b   :  { %v692_v15 = vsel %vm332_vm7, %v686_v12, %v688_v39  ;;  %v693_v18 = vsel %vm332_vm7, %v684_v4, %v686_v12  ;;  %v657_v26 = vmul.f32 %v1191_v24, %v651_v9  ;;  %vm1677_vm7 = vcmp.lt.s32.totalorder %v1074_v10, 127 }
 0x33c   :  { %v695_v17 = vmul.f32 %v1119_v58, %v693_v18  ;;  %v696_v14 = vmul.f32 %v1138_v6, %v692_v15  ;;  %vm1678_vm15 = vmmov %vm1677_vm7 }
 0x33d   :  { %797 = vmatpush.msrb.mxu2 %v657_v26  ;;  %vm1683_vm4 = vmmov %vm1677_vm7 }
 0x33e   :  { %755 = vmatpush.msrb.mxu0 %v695_v17  ;;  %775 = vmatpush.msrb.mxu1 %v696_v14  ;;  %vm1684_vm0 = vmmov %vm1683_vm4  ;;  %v703_v14 = vld [vmem:[%s1667_s2] sm:$0xff] }
 0x341   :  { %v624_v27 = vpop.permute.xlu1 %623  ;;  %v664_v5 = vpop.permute.xlu2 %663 }
 0x342   :  { %v674_v2 = vsel %vm1675_vm3, %v670_v59, %v664_v5  ;;  %v644_v28 = vpop.permute.xlu0 %643  ;;  %v634_v24 = vsel %vm1677_vm7, %v630_v13, %v624_v27  ;;  %vm1687_vm3 = vmmov %vm1685_vm5 }
 0x343   :  { %v654_v16 = vsel %vm1676_vm6, %v650_v8, %v644_v28  ;;  %v678_v33 = vmul.f32 %v1196_v25, %v674_v2  ;;  %v638_v6 = vmul.f32 %v1244_v45, %v634_v24  ;;  %vm1688_vm6 = vmmov %vm1687_vm3 }
 0x344   :  { %v658_v58 = vmul.f32 %v1206_v31, %v654_v16 }
 0x345   :  { %816 = vmatpush.msrb.mxu3 %v678_v33 }
 0x347   :  { %817 = vmatpush.msrb.mxu3 %v658_v58 }
 0x349   :  { %v604_v56 = vpop.permute.xlu1 %603  ;;  %v628_v29 = vpop.permute.xlu2 %627  ;;  %818 = vmatpush.msrb.mxu3 %v638_v6 }
 0x34a   :  { %v631_v37 = vsel %vm1678_vm15, %v628_v29, %v630_v13  ;;  %v646_v39 = vpop.permute.xlu0 %645 }
 0x34b   :  { %819 = vmatpush.msrb.mxu3 %v1474_v0  ;;  %v637_v25 = vmul.f32 %v1215_v36, %v631_v37  ;;  %v652_v31 = vsel %vm1679_vm1, %v646_v39, %v648_v57  ;;  %v653_v45 = vsel %vm1680_vm11, %v644_v28, %v646_v39 }
 0x34c   :  { %v655_v4 = vmul.f32 %v1250_v50, %v653_v45 }
 0x34d   :  { %798 = vmatpush.msrb.mxu2 %v637_v25 }
 0x34f   :  { %799 = vmatpush.msrb.mxu2 %v1466_v35 }
 0x351   :  { %v584_v40 = vpop.permute.xlu1 %583  ;;  %v666_v46 = vpop.permute.xlu2 %665 }
 0x352   :  { %v672_v47 = vsel %vm1681_vm14, %v666_v46, %v668_v53  ;;  %v673_v59 = vsel %vm1682_vm2, %v664_v5, %v666_v46  ;;  %v626_v0 = vpop.permute.xlu0 %625  ;;  %v656_v53 = vmul.f32 %v1253_v52, %v652_v31 }
 0x353   :  { %v675_v36 = vmul.f32 %v1234_v43, %v673_v59  ;;  %v676_v41 = vmul.f32 %v1239_v44, %v672_v47  ;;  %v632_v35 = vsel %vm1683_vm4, %v626_v0, %v628_v29  ;;  %v633_v57 = vsel %vm1684_vm0, %v624_v27, %v626_v0 }
 0x354   :  { %v635_v62 = vmul.f32 %v1274_v7, %v633_v57  ;;  %v636_v43 = vmul.f32 %v1279_v11, %v632_v35 }
 0x355   :  { %756 = vmatpush.msrb.mxu0 %v675_v36  ;;  %776 = vmatpush.msrb.mxu1 %v676_v41 }
 0x357   :  { %757 = vmatpush.msrb.mxu0 %v655_v4  ;;  %777 = vmatpush.msrb.mxu1 %v656_v53 }
 0x359   :  { %v602_v61 = vpop.permute.xlu2 %601  ;;  %758 = vmatpush.msrb.mxu0 %v635_v62  ;;  %778 = vmatpush.msrb.mxu1 %v636_v43  ;;  %v564_v13 = vpop.permute.xlu1 %563 }
 0x35a   :  { %v608_v44 = vsel %vm1685_vm5, %v602_v61, %v604_v56  ;;  %v606_v63 = vpop.permute.xlu0 %605 }
 0x35b   :  { %v607_v8 = vsel %vm1686_vm13, %v604_v56, %v606_v63  ;;  %759 = vmatpush.msrb.mxu0 %v1464_v34  ;;  %779 = vmatpush.msrb.mxu1 %v1476_v48  ;;  %v613_v50 = vmul.f32 %v1291_v20, %v608_v44  ;;  %v940_v20 = vld [vmem:[%s1665_s3 + $0x18] sm:$0xff] }
 0x35c   :  { %v614_v52 = vmul.f32 %v1297_v21, %v607_v8  ;;  %742 = vperm.xlu0 %960, %v940_v20  }
 0x35d   :  { %800 = vmatpush.msrb.mxu2 %v613_v50 }
 0x35e   :  { %820 = vmatpush.msrb.mxu3 %v614_v52 }
 0x361   :  { %v582_v7 = vpop.permute.xlu2 %581  ;;  %v542_v18 = vpop.permute.xlu1 %541 }
 0x362   :  { %v588_v11 = vsel %vm223_vm8, %v582_v7, %v584_v40  ;;  %v586_v9 = vpop.permute.xlu0 %585 }
 0x363   :  { %v587_v12 = vsel %vm223_vm8, %v584_v40, %v586_v9  ;;  %v593_v15 = vmul.f32 %v1320_v30, %v588_v11 }
 0x364   :  { %v594_v34 = vmul.f32 %v1323_v1, %v587_v12 }
 0x365   :  { %801 = vmatpush.msrb.mxu2 %v593_v15 }
 0x366   :  { %821 = vmatpush.msrb.mxu3 %v594_v34 }
 0x369   :  { %v562_v21 = vpop.permute.xlu2 %561  ;;  %v580_v27 = vpop.permute.xlu1 %579 }
 0x36a   :  { %v568_v48 = vsel %vm202_vm10, %v562_v21, %v564_v13  ;;  %v544_v26 = vpop.permute.xlu0 %543  ;;  %v589_v2 = vsel %vm223_vm8, %v580_v27, %v582_v7  ;;  %v590_v28 = vsel %vm223_vm8, %v586_v9, %v580_v27 }
 0x36b   :  { %v548_v17 = vsel %vm181_vm9, %v542_v18, %v544_v26  ;;  %v573_v30 = vmul.f32 %v1335_v38, %v568_v48  ;;  %v591_v24 = vmul.f32 %v1396_v19, %v590_v28  ;;  %v592_v58 = vmul.f32 %v1399_v22, %v589_v2  ;;  %v945_v28 = vld [vmem:[%s1665_s3 + $0x20] sm:$0xff] }
 0x36c   :  { %v553_v1 = vmul.f32 %v1365_v54, %v548_v17 }
 0x36d   :  { %802 = vmatpush.msrb.mxu2 %v573_v30 }
 0x36f   :  { %803 = vmatpush.msrb.mxu2 %v553_v1 }
 0x370   :  { %943 = vmatmul.msk.f32.vlgmr.msrb.gmra.mxu2 %vm387_vm12, %v703_v14 }
 0x371   :  { %v600_v5 = vpop.permute.xlu2 %599  ;;  %v540_v39 = vpop.permute.xlu1 %539 }
 0x372   :  { %v609_v38 = vsel %vm1687_vm3, %v600_v5, %v602_v61  ;;  %v610_v54 = vsel %vm1688_vm6, %v606_v63, %v600_v5  ;;  %v546_v6 = vpop.permute.xlu0 %545  ;;  %v549_v22 = vsel %vm181_vm9, %v540_v39, %v542_v18 }
 0x373   :  { %v611_v16 = vmul.f32 %v1357_v60, %v610_v54  ;;  %v612_v33 = vmul.f32 %v1362_v51, %v609_v38  ;;  %v547_v29 = vsel %vm181_vm9, %v544_v26, %v546_v6  ;;  %v550_v25 = vsel %vm181_vm9, %v546_v6, %v540_v39 }
 0x374   :  { %v554_v51 = vmul.f32 %v1413_v32, %v547_v29  ;;  %v551_v31 = vmul.f32 %v1441_v55, %v550_v25  ;;  %v552_v45 = vmul.f32 %v1444_v42, %v549_v22 }
 0x375   :  { %760 = vmatpush.msrb.mxu0 %v611_v16  ;;  %780 = vmatpush.msrb.mxu1 %v612_v33  ;;  %v946_v33 = vld [vmem:[%s1665_s3 + $0x28] sm:$0xff] }
 0x377   :  { %761 = vmatpush.msrb.mxu0 %v591_v24  ;;  %781 = vmatpush.msrb.mxu1 %v592_v58 }
 0x379   :  { %v566_v56 = vpop.permute.xlu2 %565 }
 0x37a   :  { %v567_v37 = vsel %vm202_vm10, %v564_v13, %v566_v56 }
 0x37b   :  { %v574_v60 = vmul.f32 %v1404_v23, %v567_v37 }
 0x37d   :  { %822 = vmatpush.msrb.mxu3 %v574_v60 }
 0x37f   :  { %823 = vmatpush.msrb.mxu3 %v554_v51 }
 0x380   :  { %944 = vmatmul.msk.f32.vlgmr.msrb.gmra.mxu3 %vm387_vm12, %v703_v14 }
 0x381   :  { %v560_v19 = vpop.permute.xlu2 %559 }
 0x382   :  { %v569_v40 = vsel %vm202_vm10, %v560_v19, %v562_v21  ;;  %v570_v23 = vsel %vm202_vm10, %v566_v56, %v560_v19 }
 0x383   :  { %v571_v46 = vmul.f32 %v1432_v3, %v570_v23  ;;  %v572_v32 = vmul.f32 %v1437_v49, %v569_v40 }
 0x385   :  { %762 = vmatpush.msrb.mxu0 %v571_v46  ;;  %782 = vmatpush.msrb.mxu1 %v572_v32 }
 0x387   :  { %763 = vmatpush.msrb.mxu0 %v551_v31  ;;  %783 = vmatpush.msrb.mxu1 %v552_v45 }
 0x388   :  { %941 = vmatmul.msk.f32.vlgmr.msrb.gmra.mxu0 %vm387_vm12, %v703_v14  ;;  %942 = vmatmul.msk.f32.vlgmr.msrb.gmra.mxu1 %vm387_vm12, %v703_v14 }
 0x3ce   :  { %v743_v59 = vpop.permute.xlu0 %742 }
 0x3f3   :  { %v805_v47 = vpop.f32.mrf.mxu2 }
 0x3f4   :  { %v806_v0 = vadd.f32 %v805_v47, %v743_v59 }
 0x3f6   :  { %v834_v57 = vmul.f32 0.01, %v806_v0  ;;  %vm830_vm9 = vcmp.gt.f32.partialorder %v806_v0, 0.0 }
 0x3f8   :  { %v838_v61 = vsel %vm830_vm9, %v806_v0, %v834_v57 }
 0x403   :  { %v825_v10 = vpop.f32.mrf.mxu3 }
 0x404   :  { %v826_v41 = vadd.f32 %v825_v10, %v743_v59 }
 0x405   :  { %v765_v36 = vpop.f32.mrf.mxu0  ;;  %v785_v3 = vpop.f32.mrf.mxu1 }
 0x406   :  { %v766_v49 = vadd.f32 %v765_v36, %v743_v59  ;;  %v786_v35 = vadd.f32 %v785_v3, %v743_v59  ;;  %v835_v62 = vmul.f32 0.01, %v826_v41  ;;  %vm831_vm7 = vcmp.gt.f32.partialorder %v826_v41, 0.0 }
 0x408   :  { %vm828_vm8 = vcmp.gt.f32.partialorder %v766_v49, 0.0  ;;  %v832_v55 = vmul.f32 0.01, %v766_v49  ;;  %vm829_vm10 = vcmp.gt.f32.partialorder %v786_v35, 0.0  ;;  %v833_v42 = vmul.f32 0.01, %v786_v35 }
 0x409   :  { %v839_v63 = vsel %vm831_vm7, %v826_v41, %v835_v62 }
 0x40a   :  { %v836_v4 = vsel %vm828_vm8, %v766_v49, %v832_v55  ;;  %v837_v53 = vsel %vm829_vm10, %v786_v35, %v833_v42 }
 0x40b   :  { %v844_v43 = vadd.f32 %v837_v53, %v836_v4 }
 0x40d   :  { %v845_v44 = vadd.f32 %v844_v43, %v838_v61 }
 0x40f   :  { %v846_v13 = vadd.f32 %v845_v44, %v839_v63 }
 0x411   :  { %847 = vadd.xlane.f32.xlu2 %v846_v13 }
 0x484   :  { %v848_v8 = vpop.xlane.xlu2 %847 }
 0x485   :  { %v849_v50 = vmul.f32 0.001953125, %v848_v8 }
 0x487   :  { %v850_v52 = vsub.f32 %v836_v4, %v849_v50  ;;  %v851_v7 = vsub.f32 %v837_v53, %v849_v50  ;;  %v852_v11 = vsub.f32 %v838_v61, %v849_v50  ;;  %v853_v9 = vsub.f32 %v839_v63, %v849_v50 }
 0x489   :  { %v854_v12 = vmul.f32 %v850_v52, %v850_v52  ;;  %v855_v15 = vmul.f32 %v851_v7, %v851_v7  ;;  %v856_v34 = vmul.f32 %v852_v11, %v852_v11  ;;  %v857_v20 = vmul.f32 %v853_v9, %v853_v9 }
 0x48b   :  { %v858_v18 = vadd.f32 %v855_v15, %v854_v12 }
 0x48d   :  { %v859_v21 = vadd.f32 %v858_v18, %v856_v34 }
 0x48f   :  { %v860_v48 = vadd.f32 %v859_v21, %v857_v20 }
 0x491   :  { %861 = vadd.xlane.f32.xlu1 %v860_v48 }
 0x504   :  { %v862_v26 = vpop.xlane.xlu1 %861 }
 0x505   :  { %v863_v17 = vmul.f32 0.001953125, %v862_v26 }
 0x507   :  { %v864_v30 = vadd.f32 1e-05, %v863_v17 }
 0x509   :  { %967 = vrsqrt.f32 %v864_v30  ;;  %vm871_vm15 = vweird.f32 %v864_v30 }
 0x50f   :  { %v968_v1 = vpop.eup %967 }
 0x510   :  { %v866_v14 = vmul.f32 %v968_v1, %v864_v30  ;;  %vm872_vm12 = vweird.f32 %v968_v1 }
 0x511   :  { %vm873_vm1 = vmor %vm871_vm15, %vm872_vm12 }
 0x512   :  { %v867_v27 = vmul.f32 %v968_v1, %v866_v14 }
 0x514   :  { %v868_v5 = vmul.f32 0.5, %v867_v27 }
 0x516   :  { %v869_v2 = vsub.f32 1.5, %v868_v5 }
 0x518   :  { %v870_v38 = vmul.f32 %v968_v1, %v869_v2 }
 0x51a   :  { %v874_v54 = vsel %vm873_vm1, %v968_v1, %v870_v38 }
 0x51b   :  { %v875_v16 = vmul.f32 %v945_v28, %v874_v54 }
 0x51d   :  { %878 = vperm.xlu0 %960, %v875_v16  }
 0x525   :  { %887 = vperm.xlu0 %960, %v946_v33  }
 0x58f   :  { %v879_v24 = vpop.permute.xlu0 %878 }
 0x590   :  { %v881_v58 = vmul.f32 %v879_v24, %v850_v52  ;;  %v882_v6 = vmul.f32 %v879_v24, %v851_v7  ;;  %v883_v56 = vmul.f32 %v879_v24, %v852_v11  ;;  %v884_v29 = vmul.f32 %v879_v24, %v853_v9 }
 0x597   :  { %v888_v37 = vpop.permute.xlu0 %887 }
 0x598   :  { %v890_v60 = vadd.f32 %v888_v37, %v881_v58  ;;  %v891_v51 = vadd.f32 %v888_v37, %v882_v6  ;;  %v892_v39 = vadd.f32 %v888_v37, %v883_v56  ;;  %v893_v19 = vadd.f32 %v888_v37, %v884_v29 }
 0x59a   :  { %894 = vst [vmem:[%s1668_s4] sm:$0xff] %v890_v60 }
 0x59b   :  { %895 = vst [vmem:[%s1668_s4 + $0x8] sm:$0xff] %v891_v51 }
 0x59c   :  { %896 = vst [vmem:[%s1668_s4 + $0x10] sm:$0xff] %v892_v39 }
 0x59d   :  { %897 = vst [vmem:[%s1668_s4 + $0x18] sm:$0xff] %v893_v19 }

</bundles_post_ra>
